<compile_context>
chip_gen: v6e
topology: v6e:2x2x1
jax: 0.10.0
libtpu: 0.0.40
codegen_flags: <defaults>
</compile_context>

<pallas_src>
import functools

import jax
import jax.numpy as jnp
import numpy as np
from jax.experimental import pallas as pl
from jax.experimental.pallas import tpu as pltpu


# ----------------------------------------------------------------------------- helpers


def _round_up(a, b):
    return (a + b - 1) // b * b


def _pick_rows(m_rows, lanes_in, lanes_out, target_bytes=4 << 20):
    """Rows per tile so the (input + output) tile is ~target_bytes of padded VMEM."""
    row_bytes = 4 * (_round_up(lanes_in, 128) + _round_up(lanes_out, 128))
    tm = (target_bytes // row_bytes) // 8 * 8
    return max(8, min(tm, _round_up(m_rows, 8)))


def _pad_even(x):
    """Zero-pad H/W up to even sizes. Returns (x_padded, Hp, Wp)."""
    _, _, H, W = x.shape
    pad_h, pad_w = H % 2, W % 2
    if pad_h or pad_w:
        x = jnp.pad(x, ((0, 0), (0, 0), (0, pad_h), (0, pad_w)))
    return x, H + pad_h, W + pad_w


def _poly_max(coeffs, elems):
    """max_k (a_k*e0 + b_k*e1 + c_k*e2 + d_k*e3) with static, pruned coefficients."""

    def poly(cf):
        acc = None
        for c, e in zip(cf, elems):
            if c == 0.0:            # prune zero terms entirely
                continue
            term = e if c == 1.0 else c * e   # skip the multiply for unit scales
            acc = term if acc is None else acc + term
        return jnp.zeros_like(elems[0]) if acc is None else acc

    polys = [poly(cf) for cf in coeffs]
    # Balanced max tree: shorter dependency chain than a linear scan (more VALU ILP).
    while len(polys) > 1:
        nxt = [jnp.maximum(polys[i], polys[i + 1]) for i in range(0, len(polys) - 1, 2)]
        if len(polys) % 2:
            nxt.append(polys[-1])
        polys = nxt
    return polys[0]


_COMPILER_PARAMS = pltpu.CompilerParams(
    dimension_semantics=("parallel",),          # shard the row grid across v7x's 2 TCs
    vmem_limit_bytes=32 * 1024 * 1024,          # v7x-safe scoped VMEM cap
)


# ------------------------------------------------------------------- primary (fused) path


@functools.partial(jax.jit, static_argnames=("coeffs",))
def _forward_strided(x, coeffs):
    """Fused path: free reshape of padded x + in-kernel lane-strided deinterleave."""
    B, C, H, W = x.shape
    x, Hp, Wp = _pad_even(x.astype(jnp.float32))
    H2, W2 = Hp // 2, Wp // 2
    M = B * C * H2
    Lin = 2 * Wp                      # one row = [H-row 2i | H-row 2i+1] of one image
    x2d = x.reshape(M, Lin)           # pure dim-collapse: no HBM data movement

    tm = _pick_rows(M, Lin, W2)
    grid = (pl.cdiv(M, tm),)

    def kernel(x_ref, o_ref):
        # Deinterleave the 2x2 block elements with lane-strided reads (stride 2):
        #   e0 @ lanes 0,2,..  e1 @ 1,3,..  e2 @ Wp,Wp+2,..  e3 @ Wp+1,Wp+3,..
        elems = [x_ref[:, pl.ds(s, W2, stride=2)] for s in (0, 1, Wp, Wp + 1)]
        o_ref[...] = _poly_max(coeffs, elems)

    out = pl.pallas_call(
        kernel,
        out_shape=jax.ShapeDtypeStruct((M, W2), jnp.float32),
        grid=grid,
        in_specs=[pl.BlockSpec((tm, Lin), lambda i: (i, 0))],
        out_specs=pl.BlockSpec((tm, W2), lambda i: (i, 0)),
        compiler_params=_COMPILER_PARAMS,
    )(x2d)
    return out.reshape(B, C, H2, W2)


# -------------------------------------------------------------- compatibility (slab) path


@functools.partial(jax.jit, static_argnames=("coeffs",))
def _forward_slab(x, coeffs):
    """Fallback: XLA space-to-depth slab (one extra HBM pass) + the same tiled kernel."""
    B, C, H, W = x.shape
    x, Hp, Wp = _pad_even(x.astype(jnp.float32))
    H2, W2 = Hp // 2, Wp // 2
    M = B * C * H2

    xb = x.reshape(B, C, H2, 2, W2, 2)
    blocks = jnp.stack(
        [xb[:, :, :, 0, :, 0], xb[:, :, :, 0, :, 1],
         xb[:, :, :, 1, :, 0], xb[:, :, :, 1, :, 1]],
        axis=0,
    ).reshape(4, M, W2)

    tm = _pick_rows(M, 4 * _round_up(W2, 128), W2)
    grid = (pl.cdiv(M, tm),)

    def kernel(b_ref, o_ref):
        elems = [b_ref[k] for k in range(4)]
        o_ref[...] = _poly_max(coeffs, elems)

    out = pl.pallas_call(
        kernel,
        out_shape=jax.ShapeDtypeStruct((M, W2), jnp.float32),
        grid=grid,
        in_specs=[pl.BlockSpec((4, tm, W2), lambda i: (0, i, 0))],
        out_specs=pl.BlockSpec((tm, W2), lambda i: (i, 0)),
        compiler_params=_COMPILER_PARAMS,
    )(blocks)
    return out.reshape(B, C, H2, W2)


# ------------------------------------------------------------------------- public wrapper

_USE_STRIDED = None  # feature-detection cache for lane-strided ref loads


def poset_filter_forward(x, coeffs):
    """Forward pass of _PosetFilter. x: (B, C, H, W) float; coeffs: iterable of 4-tuples."""
    coeffs = tuple(tuple(float(c) for c in cf) for cf in coeffs)
    if len(coeffs) == 0:
        raise ValueError("coeffs must contain at least one (a, b, c, d) quadruple")
    if any(len(cf) != 4 for cf in coeffs):
        raise ValueError("every coefficient entry must have exactly 4 values")

    global _USE_STRIDED
    if _USE_STRIDED is None:
        try:
            out = _forward_strided(x, coeffs)
            jax.block_until_ready(out)
            _USE_STRIDED = True
            return out
        except Exception:
            # Mosaic build without lane-strided load lowering: use the slab path.
            _USE_STRIDED = False
    return (_forward_strided if _USE_STRIDED else _forward_slab)(x, coeffs)


# ---------------------------------------------------------------------------- reference


def _reference_forward(x, coeffs):
    """Pure-JAX reference mirroring the PyTorch module."""
    B, C, H, W = x.shape
    x, Hp, Wp = _pad_even(x.astype(jnp.float32))
    H2, W2 = Hp // 2, Wp // 2
    xb = x.reshape(B, C, H2, 2, W2, 2)
    blocks = jnp.stack(
        [xb[:, :, :, 0, :, 0], xb[:, :, :, 0, :, 1],
         xb[:, :, :, 1, :, 0], xb[:, :, :, 1, :, 1]], axis=-1)  # (B,C,H2,W2,4)
    polys = [a * blocks[..., 0] + b * blocks[..., 1]
             + c * blocks[..., 2] + d * blocks[..., 3]
             for (a, b, c, d) in coeffs]
    return jnp.max(jnp.stack(polys, axis=-1), axis=-1)


# TODO(synk): autograd ctx bookkeeping (save_for_backward / max_idx) is backward-only
# state in the PyTorch module and is not part of the forward output, so it is omitted.

if __name__ == "__main__":
    key = jax.random.PRNGKey(0)

    # 4 corner selectors + the mean => a strictly-richer variant of 2x2 max pooling.
    coeffs = [
        [1.0, 0.0, 0.0, 0.0],
        [0.0, 1.0, 0.0, 0.0],
        [0.0, 0.0, 1.0, 0.0],
        [0.0, 0.0, 0.0, 1.0],
        [0.25, 0.25, 0.25, 0.25],
    ]

    # Main test: even spatial dims.
    B, C, H, W = 2, 4, 16, 16
    x = jax.random.normal(key, (B, C, H, W), dtype=jnp.float32)
    out = jax.block_until_ready(poset_filter_forward(x, coeffs))
    ref = _reference_forward(x, coeffs)
    np.testing.assert_allclose(np.asarray(out), np.asarray(ref), rtol=1e-6, atol=1e-6)
    assert out.shape == (B, C, H // 2, W // 2)

    # Secondary test: odd spatial dims exercise the zero-padding path.
    x2 = jax.random.normal(jax.random.PRNGKey(1), (2, 3, 15, 9), dtype=jnp.float32)
    out2 = jax.block_until_ready(poset_filter_forward(x2, coeffs))
    ref2 = _reference_forward(x2, coeffs)
    np.testing.assert_allclose(np.asarray(out2), np.asarray(ref2), rtol=1e-6, atol=1e-6)
    assert out2.shape == (2, 3, 8, 5)

    print("KERNEL_OK")
</pallas_src>

<mosaic_0001>
module attributes {stable_mosaic.version = 11 : i64} {
  func.func @kernel(%arg0: i32, %arg1: memref<64x32xf32, #tpu.memory_space<vmem>>, %arg2: memref<64x8xf32, #tpu.memory_space<vmem>>) attributes {dimension_semantics = [#tpu.dimension_semantics<parallel>], iteration_bounds = array<i64: 1>, scalar_prefetch = 0 : i64, scratch_operands = 0 : i64, tpu.core_type = #tpu.core_type<tc>, window_params = [{transform_indices = @transform_0, window_bounds = array<i64: 64, 32>}, {transform_indices = @transform_1, window_bounds = array<i64: 64, 8>}]} {
    %c0 = arith.constant 0 : index
    %c0_0 = arith.constant 0 : index
    %0 = tpu.strided_load %arg1[%c0, %c0_0] {strides = array<i32: 1, 2>} : memref<64x32xf32, #tpu.memory_space<vmem>>, vector<64x8xf32>
    %c0_1 = arith.constant 0 : index
    %c1 = arith.constant 1 : index
    %1 = tpu.strided_load %arg1[%c0_1, %c1] {strides = array<i32: 1, 2>} : memref<64x32xf32, #tpu.memory_space<vmem>>, vector<64x8xf32>
    %c0_2 = arith.constant 0 : index
    %c16 = arith.constant 16 : index
    %2 = tpu.strided_load %arg1[%c0_2, %c16] {strides = array<i32: 1, 2>} : memref<64x32xf32, #tpu.memory_space<vmem>>, vector<64x8xf32>
    %c0_3 = arith.constant 0 : index
    %c17 = arith.constant 17 : index
    %3 = tpu.strided_load %arg1[%c0_3, %c17] {strides = array<i32: 1, 2>} : memref<64x32xf32, #tpu.memory_space<vmem>>, vector<64x8xf32>
    %cst = arith.constant 2.500000e-01 : f32
    %4 = vector.broadcast %cst : f32 to vector<64x8xf32>
    %5 = arith.mulf %4, %0 : vector<64x8xf32>
    %cst_4 = arith.constant 2.500000e-01 : f32
    %6 = vector.broadcast %cst_4 : f32 to vector<64x8xf32>
    %7 = arith.mulf %6, %1 : vector<64x8xf32>
    %8 = arith.addf %5, %7 : vector<64x8xf32>
    %cst_5 = arith.constant 2.500000e-01 : f32
    %9 = vector.broadcast %cst_5 : f32 to vector<64x8xf32>
    %10 = arith.mulf %9, %2 : vector<64x8xf32>
    %11 = arith.addf %8, %10 : vector<64x8xf32>
    %cst_6 = arith.constant 2.500000e-01 : f32
    %12 = vector.broadcast %cst_6 : f32 to vector<64x8xf32>
    %13 = arith.mulf %12, %3 : vector<64x8xf32>
    %14 = arith.addf %11, %13 : vector<64x8xf32>
    %15 = arith.maximumf %0, %1 : vector<64x8xf32>
    %16 = arith.maximumf %2, %3 : vector<64x8xf32>
    %17 = arith.maximumf %15, %16 : vector<64x8xf32>
    %18 = arith.maximumf %17, %14 : vector<64x8xf32>
    %c0_7 = arith.constant 0 : index
    %c0_8 = arith.constant 0 : index
    %19 = vector.load %arg2[%c0_7, %c0_8] : memref<64x8xf32, #tpu.memory_space<vmem>>, vector<64x8xf32>
    tpu.vector_store %arg2[%c0_7, %c0_8], %18 {strides = array<i32>} : memref<64x8xf32, #tpu.memory_space<vmem>>, vector<64x8xf32>,
    return
  }
  func.func @transform_0(%arg0: i32) -> (i32, i32) {
    %c0_i32 = arith.constant 0 : i32
    %c0_i32_0 = arith.constant 0 : i32
    return %arg0, %c0_i32 : i32, i32
  }
  func.func @transform_1(%arg0: i32) -> (i32, i32) {
    %c0_i32 = arith.constant 0 : i32
    %c0_i32_0 = arith.constant 0 : i32
    return %arg0, %c0_i32 : i32, i32
  }
}

module attributes {stable_mosaic.version = 11 : i64} {
  func.func @kernel(%arg0: i32, %arg1: memref<4x64x8xf32, #tpu.memory_space<vmem>>, %arg2: memref<64x8xf32, #tpu.memory_space<vmem>>) attributes {dimension_semantics = [#tpu.dimension_semantics<parallel>], iteration_bounds = array<i64: 1>, scalar_prefetch = 0 : i64, scratch_operands = 0 : i64, tpu.core_type = #tpu.core_type<tc>, window_params = [{transform_indices = @transform_0, window_bounds = array<i64: 4, 64, 8>}, {transform_indices = @transform_1, window_bounds = array<i64: 64, 8>}]} {
    %c0 = arith.constant 0 : index
    %c0_0 = arith.constant 0 : index
    %c0_1 = arith.constant 0 : index
    %0 = vector.load %arg1[%c0, %c0_0, %c0_1] : memref<4x64x8xf32, #tpu.memory_space<vmem>>, vector<1x64x8xf32>
    %1 = vector.shape_cast %0 : vector<1x64x8xf32> to vector<64x8xf32>
    %c1 = arith.constant 1 : index
    %c0_2 = arith.constant 0 : index
    %c0_3 = arith.constant 0 : index
    %2 = vector.load %arg1[%c1, %c0_2, %c0_3] : memref<4x64x8xf32, #tpu.memory_space<vmem>>, vector<1x64x8xf32>
    %3 = vector.shape_cast %2 : vector<1x64x8xf32> to vector<64x8xf32>
    %c2 = arith.constant 2 : index
    %c0_4 = arith.constant 0 : index
    %c0_5 = arith.constant 0 : index
    %4 = vector.load %arg1[%c2, %c0_4, %c0_5] : memref<4x64x8xf32, #tpu.memory_space<vmem>>, vector<1x64x8xf32>
    %5 = vector.shape_cast %4 : vector<1x64x8xf32> to vector<64x8xf32>
    %c3 = arith.constant 3 : index
    %c0_6 = arith.constant 0 : index
    %c0_7 = arith.constant 0 : index
    %6 = vector.load %arg1[%c3, %c0_6, %c0_7] : memref<4x64x8xf32, #tpu.memory_space<vmem>>, vector<1x64x8xf32>
    %7 = vector.shape_cast %6 : vector<1x64x8xf32> to vector<64x8xf32>
    %cst = arith.constant 2.500000e-01 : f32
    %8 = vector.broadcast %cst : f32 to vector<64x8xf32>
    %9 = arith.mulf %8, %1 : vector<64x8xf32>
    %cst_8 = arith.constant 2.500000e-01 : f32
    %10 = vector.broadcast %cst_8 : f32 to vector<64x8xf32>
    %11 = arith.mulf %10, %3 : vector<64x8xf32>
    %12 = arith.addf %9, %11 : vector<64x8xf32>
    %cst_9 = arith.constant 2.500000e-01 : f32
    %13 = vector.broadcast %cst_9 : f32 to vector<64x8xf32>
    %14 = arith.mulf %13, %5 : vector<64x8xf32>
    %15 = arith.addf %12, %14 : vector<64x8xf32>
    %cst_10 = arith.constant 2.500000e-01 : f32
    %16 = vector.broadcast %cst_10 : f32 to vector<64x8xf32>
    %17 = arith.mulf %16, %7 : vector<64x8xf32>
    %18 = arith.addf %15, %17 : vector<64x8xf32>
    %19 = arith.maximumf %1, %3 : vector<64x8xf32>
    %20 = arith.maximumf %5, %7 : vector<64x8xf32>
    %21 = arith.maximumf %19, %20 : vector<64x8xf32>
    %22 = arith.maximumf %21, %18 : vector<64x8xf32>
    %c0_11 = arith.constant 0 : index
    %c0_12 = arith.constant 0 : index
    %23 = vector.load %arg2[%c0_11, %c0_12] : memref<64x8xf32, #tpu.memory_space<vmem>>, vector<64x8xf32>
    tpu.vector_store %arg2[%c0_11, %c0_12], %22 {strides = array<i32>} : memref<64x8xf32, #tpu.memory_space<vmem>>, vector<64x8xf32>,
    return
  }
  func.func @transform_0(%arg0: i32) -> (i32, i32, i32) {
    %c0_i32 = arith.constant 0 : i32
    %c0_i32_0 = arith.constant 0 : i32
    %c0_i32_1 = arith.constant 0 : i32
    return %c0_i32, %arg0, %c0_i32_0 : i32, i32, i32
  }
  func.func @transform_1(%arg0: i32) -> (i32, i32) {
    %c0_i32 = arith.constant 0 : i32
    %c0_i32_0 = arith.constant 0 : i32
    return %arg0, %c0_i32 : i32, i32
  }
}

</mosaic_0001>

<bundles_post_ra>
// kernel: _forward_slab.1
= control target key start
LH: loop header
LB: loop body
LE: loop exit
PB: predicated region body
PF: predicated region fallthrough
CT: control target
= control target key end

     0   :  { %vm132_vm0 = vcmask 64512   ;;  %s326_s0 = inlined_call_operand.vmem [shape: f32[4,64,8], index: 0, kind: input, shape index: {}]   ;;  %s327_s1 = inlined_call_operand.hbm [shape: f32[64,8], index: 1, kind: output, shape index: {}]  }
   0x1   :  { %v9_v0 = vld [vmem:[%s326_s0] sm:$0xff]  ;;  %v10_v8 = vld [vmem:[%s326_s0 + $0x8] sm:$0xff]  ;;  %v11_v16 = vld [vmem:[%s326_s0 + $0x10] sm:$0xff] }
   0x2   :  { %v157_v1 = vld [vmem:[%s326_s0 + $0x40] sm:$0xff]  ;;  %v44_v4 = vmul.f32 0.25, %v9_v0  ;;  %v158_v9 = vld [vmem:[%s326_s0 + $0x48] sm:$0xff]  ;;  %v45_v14 = vmul.f32 0.25, %v10_v8  ;;  %v159_v21 = vld [vmem:[%s326_s0 + $0x50] sm:$0xff]  ;;  %v46_v27 = vmul.f32 0.25, %v11_v16 }
   0x3   :  { %v165_v2 = vld [vmem:[%s326_s0 + $0x80] sm:$0xff]  ;;  %v52_v5 = vmul.f32 0.25, %v157_v1  ;;  %v100_v7 = vmax.f32 %v9_v0, %v157_v1  ;;  %v166_v12 = vld [vmem:[%s326_s0 + $0x88] sm:$0xff]  ;;  %v53_v15 = vmul.f32 0.25, %v158_v9  ;;  %v101_v20 = vmax.f32 %v10_v8, %v158_v9  ;;  %v167_v22 = vld [vmem:[%s326_s0 + $0x90] sm:$0xff] }
   0x4   :  { %v173_v3 = vld [vmem:[%s326_s0 + $0xc0] sm:$0xff]  ;;  %v68_v6 = vmul.f32 0.25, %v165_v2  ;;  %v174_v13 = vld [vmem:[%s326_s0 + $0xc8] sm:$0xff]  ;;  %v69_v18 = vmul.f32 0.25, %v166_v12  ;;  %v175_v23 = vld [vmem:[%s326_s0 + $0xd0] sm:$0xff]  ;;  %v54_v31 = vmul.f32 0.25, %v159_v21  ;;  %v102_v38 = vmax.f32 %v11_v16, %v159_v21 }
   0x5   :  { %v84_v10 = vmul.f32 0.25, %v173_v3  ;;  %v108_v11 = vmax.f32 %v165_v2, %v173_v3  ;;  %v60_v17 = vadd.f32 %v52_v5, %v44_v4  ;;  %v85_v19 = vmul.f32 0.25, %v174_v13  ;;  %v12_v28 = vld [vmem:[%s326_s0 + $0x18] sm:$0xff]  ;;  %v13_v44 = vld [vmem:[%s326_s0 + $0x20] sm:$0xff]  ;;  %v14_v60 = vld [vmem:[%s326_s0 + $0x28] sm:$0xff] }
   0x6   :  { %v61_v25 = vadd.f32 %v53_v15, %v45_v14  ;;  %v109_v26 = vmax.f32 %v166_v12, %v174_v13  ;;  %v160_v29 = vld [vmem:[%s326_s0 + $0x58] sm:$0xff]  ;;  %v70_v32 = vmul.f32 0.25, %v167_v22  ;;  %v86_v33 = vmul.f32 0.25, %v175_v23  ;;  %v161_v45 = vld [vmem:[%s326_s0 + $0x60] sm:$0xff]  ;;  %v162_v61 = vld [vmem:[%s326_s0 + $0x68] sm:$0xff] }
   0x7   :  { %v116_v24 = vmax.f32 %v100_v7, %v108_v11  ;;  %v76_v30 = vadd.f32 %v68_v6, %v60_v17  ;;  %v168_v34 = vld [vmem:[%s326_s0 + $0x98] sm:$0xff]  ;;  %v110_v39 = vmax.f32 %v167_v22, %v175_v23  ;;  %v62_v41 = vadd.f32 %v54_v31, %v46_v27  ;;  %v169_v50 = vld [vmem:[%s326_s0 + $0xa0] sm:$0xff] }
   0x8   :  { %v176_v35 = vld [vmem:[%s326_s0 + $0xd8] sm:$0xff]  ;;  %v77_v36 = vadd.f32 %v69_v18, %v61_v25  ;;  %v117_v37 = vmax.f32 %v101_v20, %v109_v26  ;;  %v47_v42 = vmul.f32 0.25, %v12_v28  ;;  %v55_v43 = vmul.f32 0.25, %v160_v29  ;;  %v177_v51 = vld [vmem:[%s326_s0 + $0xe0] sm:$0xff] }
   0x9   :  { %v92_v40 = vadd.f32 %v84_v10, %v76_v30  ;;  %v118_v47 = vmax.f32 %v102_v38, %v110_v39  ;;  %v71_v48 = vmul.f32 0.25, %v168_v34  ;;  %v87_v49 = vmul.f32 0.25, %v176_v35 }
   0xa   :  { %v93_v46 = vadd.f32 %v85_v19, %v77_v36  ;;  %v78_v53 = vadd.f32 %v70_v32, %v62_v41  ;;  %v63_v54 = vadd.f32 %v55_v43, %v47_v42  ;;  %v103_v55 = vmax.f32 %v12_v28, %v160_v29 }
   0xb   :  { %v124_v52 = vmax.f32 %v116_v24, %v92_v40  ;;  %v111_v57 = vmax.f32 %v168_v34, %v176_v35  ;;  %v48_v58 = vmul.f32 0.25, %v13_v44  ;;  %v56_v59 = vmul.f32 0.25, %v161_v45 }
   0xc   :  { %v125_v56 = vmax.f32 %v117_v37, %v93_v46 }
   0xd   :  { %6 = vsyncpa [#allocation3], 0  ;;  %133 = vst.msk [vmem:[#allocation2] sm:$0xff] %vm132_vm0, %v124_v52  ;;  %v94_v62 = vadd.f32 %v86_v33, %v78_v53  ;;  %v79_v63 = vadd.f32 %v71_v48, %v63_v54  ;;  %v72_v0 = vmul.f32 0.25, %v169_v50  ;;  %v88_v1 = vmul.f32 0.25, %v177_v51  ;;  %v170_v2 = vld [vmem:[%s326_s0 + $0xa8] sm:$0xff] }
   0xe   :  { %v178_v3 = vld [vmem:[%s326_s0 + $0xe8] sm:$0xff]  ;;  %134 = vst.msk [vmem:[#allocation2 + $0x8] sm:$0xff] %vm132_vm0, %v125_v56  ;;  %v119_v4 = vmax.f32 %v103_v55, %v111_v57  ;;  %v64_v5 = vadd.f32 %v56_v59, %v48_v58  ;;  %v104_v6 = vmax.f32 %v13_v44, %v161_v45  ;;  %v112_v7 = vmax.f32 %v169_v50, %v177_v51  ;;  %v15_v12 = vld [vmem:[%s326_s0 + $0x30] sm:$0xff]  ;;  %v16_v24 = vld [vmem:[%s326_s0 + $0x38] sm:$0xff] }
   0xf   :  { %v126_v8 = vmax.f32 %v118_v47, %v94_v62  ;;  %v95_v9 = vadd.f32 %v87_v49, %v79_v63  ;;  %v49_v10 = vmul.f32 0.25, %v14_v60  ;;  %v57_v11 = vmul.f32 0.25, %v162_v61  ;;  %v163_v13 = vld [vmem:[%s326_s0 + $0x70] sm:$0xff]  ;;  %v164_v29 = vld [vmem:[%s326_s0 + $0x78] sm:$0xff] }
  0x10   :  { %v171_v14 = vld [vmem:[%s326_s0 + $0xb0] sm:$0xff]  ;;  %v80_v15 = vadd.f32 %v72_v0, %v64_v5  ;;  %v120_v16 = vmax.f32 %v104_v6, %v112_v7  ;;  %v73_v17 = vmul.f32 0.25, %v170_v2  ;;  %v89_v18 = vmul.f32 0.25, %v178_v3  ;;  %v172_v30 = vld [vmem:[%s326_s0 + $0xb8] sm:$0xff] }
  0x11   :  { %v179_v19 = vld [vmem:[%s326_s0 + $0xf0] sm:$0xff]  ;;  %135 = vst.msk [vmem:[#allocation2 + $0x10] sm:$0xff] %vm132_vm0, %v126_v8  ;;  %v127_v20 = vmax.f32 %v119_v4, %v95_v9  ;;  %v65_v21 = vadd.f32 %v57_v11, %v49_v10  ;;  %v105_v22 = vmax.f32 %v14_v60, %v162_v61  ;;  %v113_v23 = vmax.f32 %v170_v2, %v178_v3  ;;  %v180_v35 = vld [vmem:[%s326_s0 + $0xf8] sm:$0xff]  ;;  %s206_s0 = smov [#allocation2]  }
  0x12   :  { %v96_v25 = vadd.f32 %v88_v1, %v80_v15  ;;  %v50_v26 = vmul.f32 0.25, %v15_v12  ;;  %v58_v27 = vmul.f32 0.25, %v163_v13  ;;  %v74_v28 = vmul.f32 0.25, %v171_v14  ;;  %s146_s12 = sshll.u32 %s206_s0, 4  ;;  %s147_s12 = int_to_ptr.vmem [resolvable:$true] %s146_s12 }
  0x13   :  { %136 = vst.msk [vmem:[#allocation2 + $0x18] sm:$0xff] %vm132_vm0, %v127_v20  ;;  %v81_v31 = vadd.f32 %v73_v17, %v65_v21  ;;  %v121_v32 = vmax.f32 %v105_v22, %v113_v23  ;;  %v90_v33 = vmul.f32 0.25, %v179_v19  ;;  %v106_v34 = vmax.f32 %v15_v12, %v163_v13  ;;  %s184_s13 = scalar_lea.vmem %s147_s12, 1024  ;;  %p189_p1 = scmp.lt.s32.totalorder %s147_s12, %s147_s12 }
  0x14   :  { %v128_v36 = vmax.f32 %v120_v16, %v96_v25  ;;  %v66_v37 = vadd.f32 %v58_v27, %v50_v26  ;;  %v114_v38 = vmax.f32 %v171_v14, %v179_v19  ;;  %v51_v39 = vmul.f32 0.25, %v16_v24  ;;  %p185_p0 = scmp.ne.s32.totalorder %s147_s12, %s184_s13  ;;  %p190_p2 = scmp.lt.s32.totalorder %s184_s13, %s184_s13 }
  0x15   :  { %v97_v40 = vadd.f32 %v89_v18, %v81_v31  ;;  %v59_v41 = vmul.f32 0.25, %v164_v29  ;;  %v75_v42 = vmul.f32 0.25, %v172_v30  ;;  %v107_v45 = vmax.f32 %v16_v24, %v164_v29 }
  0x16   :  { %137 = vst.msk [vmem:[#allocation2 + $0x20] sm:$0xff] %vm132_vm0, %v128_v36  ;;  %v82_v43 = vadd.f32 %v74_v28, %v66_v37  ;;  %v122_v44 = vmax.f32 %v106_v34, %v114_v38  ;;  %v115_v46 = vmax.f32 %v172_v30, %v180_v35  ;;  %v91_v49 = vmul.f32 0.25, %v180_v35  ;;  %p191_p3 = por %p190_p2, %p189_p1 }
  0x17   :  { %v129_v47 = vmax.f32 %v121_v32, %v97_v40  ;;  %v67_v48 = vadd.f32 %v59_v41, %v51_v39 }
  0x18   :  { %v98_v50 = vadd.f32 %v90_v33, %v82_v43  ;;  %v123_v52 = vmax.f32 %v107_v45, %v115_v46  ;;  %p192_p4 = pnand %p191_p3, %p185_p0 }
  0x19   :  { %138 = vst.msk [vmem:[#allocation2 + $0x28] sm:$0xff] %vm132_vm0, %v129_v47  ;;  %v83_v51 = vadd.f32 %v75_v42, %v67_v48 }
  0x1a   :  { %v130_v53 = vmax.f32 %v122_v44, %v98_v50 }
  0x1b   :  { %v99_v54 = vadd.f32 %v91_v49, %v83_v51 }
  0x1c   :  { %139 = vst.msk [vmem:[#allocation2 + $0x30] sm:$0xff] %vm132_vm0, %v130_v53 }
  0x1d   :  { %v131_v55 = vmax.f32 %v123_v52, %v99_v54 }
  0x1f   :  { %140 = vst.msk [vmem:[#allocation2 + $0x38] sm:$0xff] %vm132_vm0, %v131_v55 }
  0x20   :  { %195 = shalt.err (!%p192_p4)
}
  0x21   :  { %s207_s14 = smov 128   ;;  %s208_s15 = smov 8  }
  0x22   :  { %152 = dma.vmem_to_hbm [thread:$0]  %s147_s12, 1024, %s327_s1, [#allocation3], %s207_s14, %s207_s14, %s208_s15  }
  0x23   :  { %204 = dma.done.wait [#allocation3], 1024  }
  0x24   :  { %205 = vsyncadd [#allocation3], 4294966272 }
  0x25   :  { %156 = vsyncpa [#allocation3], 1 }

</bundles_post_ra>
